<compile_context>
chip_gen: v7x
topology: tpu7x:2x2x1
jax: 0.10.0
libtpu: 0.0.40
codegen_flags: <defaults>
</compile_context>

<pallas_src>
import functools

import jax
import jax.numpy as jnp
import numpy as np
from jax.experimental import pallas as pl
from jax.experimental.pallas import tpu as pltpu


# ----------------------------------------------------------------------------
# Kernel 1: scatter the (pre-computed) fill value into X[all_nan_rows, col].
#           Only the A touched rows are DMA'd; X is aliased in/out.
# ----------------------------------------------------------------------------
def _impute_pallas(X, fill, all_nan_idx, col):
    """X[all_nan_idx(valid), col] = fill  (fill computed in plain JAX)."""
    N, F = X.shape
    A = all_nan_idx.shape[0]

    idx = all_nan_idx.astype(jnp.int32)
    # -1 padding slots: remap to an already-valid row (the write is idempotent,
    # so duplicates / pipelined write-back races are harmless), then clamp so no
    # OOB DMA can ever be issued.
    idx = jnp.where(idx >= 0, idx, jnp.max(idx))
    idx = jnp.maximum(idx, 0)

    fill = fill.astype(X.dtype).reshape(1)           # (1,) SMEM scalar
    X3 = X.reshape(N, 1, F)                          # rows become (1, F) tiles

    def kernel(idx_ref, fill_ref, x_ref, o_ref):
        del idx_ref  # only used in the index maps
        row = x_ref[...]                                             # (1, 1, F)
        col_ids = jax.lax.broadcasted_iota(jnp.int32, (1, 1, F), 2)
        o_ref[...] = jnp.where(col_ids == col, fill_ref[0],
                               row).astype(o_ref.dtype)

    out3 = pl.pallas_call(
        kernel,
        out_shape=jax.ShapeDtypeStruct((N, 1, F), X.dtype),
        grid_spec=pltpu.PrefetchScalarGridSpec(
            num_scalar_prefetch=1,
            grid=(A,),
            in_specs=[
                pl.BlockSpec(memory_space=pltpu.MemorySpace.SMEM),      # fill
                pl.BlockSpec((1, 1, F), lambda a, idx: (idx[a], 0, 0)),  # X row
            ],
            out_specs=pl.BlockSpec((1, 1, F), lambda a, idx: (idx[a], 0, 0)),
        ),
        # input index counts the scalar-prefetch arg: (idx=0, fill=1, X3=2)
        input_output_aliases={2: 0},
        compiler_params=pltpu.CompilerParams(
            dimension_semantics=("arbitrary",)),
    )(idx, fill, X3)
    return out3.reshape(N, F)


# ----------------------------------------------------------------------------
# Kernel 2: dist_subset = dist_chunk[row_map][:, potential_donors_idx]
#           DMA row gather (data-dependent index_map) into a VMEM scratch,
#           then one batched one-hot column-selection matmul on the last step.
# ----------------------------------------------------------------------------
def _gather_pallas(dist_chunk, row_map, donors_idx):
    C, M = dist_chunk.shape
    R = row_map.shape[0]
    D = donors_idx.shape[0]

    dchunk3 = dist_chunk.astype(jnp.float32).reshape(C, 1, M)
    row_map = row_map.astype(jnp.int32)

    # One-hot selector hoisted out of the kernel (computed once, loaded once:
    # its block index never changes across the grid).
    # sel[m, d] = 1.0 iff potential_donors_idx[d] == m
    sel = (jnp.arange(M, dtype=jnp.int32)[:, None]
           == donors_idx.astype(jnp.int32)[None, :]).astype(jnp.float32)

    def kernel(rowmap_ref, sel_ref, drow_ref, out_ref, rows_sc):
        r = pl.program_id(0)
        # -1 padded slots -> zero row (so padded output rows are exactly 0)
        valid = (rowmap_ref[r] >= 0).astype(jnp.float32)
        rows_sc[pl.ds(r, 1), :] = drow_ref[...].reshape(1, M) * valid

        @pl.when(r == pl.num_programs(0) - 1)
        def _():
            out_ref[...] = jnp.dot(
                rows_sc[...], sel_ref[...],
                preferred_element_type=jnp.float32,
                precision=jax.lax.Precision.HIGHEST)        # exact selection

    out = pl.pallas_call(
        kernel,
        out_shape=jax.ShapeDtypeStruct((R, D), jnp.float32),
        grid_spec=pltpu.PrefetchScalarGridSpec(
            num_scalar_prefetch=1,
            grid=(R,),
            in_specs=[
                pl.BlockSpec((M, D), lambda r, rowmap: (0, 0)),           # sel
                pl.BlockSpec((1, 1, M),
                             lambda r, rowmap: (jnp.maximum(rowmap[r], 0), 0, 0)),
            ],
            out_specs=pl.BlockSpec((R, D), lambda r, rowmap: (0, 0)),
            scratch_shapes=[pltpu.VMEM((R, M), jnp.float32)],
        ),
        compiler_params=pltpu.CompilerParams(
            dimension_semantics=("arbitrary",)),   # output/scratch carried across grid
    )(row_map, sel, dchunk3)
    return out


# ----------------------------------------------------------------------------
# ColProcessorCond forward (JAX glue + lax.cond around the Pallas kernels)
# ----------------------------------------------------------------------------
def col_processor_cond(X, dist_subset, mask_fit_X, fit_X, receivers_idx,
                       all_nan_receivers_idx, all_nan_dist_mask, dist_chunk,
                       dist_idx_map, potential_donors_idx, *, col):
    R = receivers_idx.shape[0]
    N = X.shape[0]

    # torch: all_nan_receivers_idx.numel() > 0 -> count of valid (non -1) entries
    # TODO(synk): true dynamic numel is not expressible with static JAX shapes;
    #             emulated via -1 padding.
    n_all_nan = jnp.sum(all_nan_receivers_idx >= 0)

    def all_nan_branch(_):
        # fill-value statistics hoisted out of the Pallas kernel (plain JAX)
        mask_ = 1.0 - mask_fit_X[:, col].astype(jnp.float32)
        mask_sum = jnp.sum(mask_)
        col_sum = jnp.sum(fit_X[:, col].astype(jnp.float32) * mask_)
        div = jnp.where(mask_sum > 0.0, mask_sum, jnp.float32(1.0))
        fill = (col_sum / div).reshape(1)

        X_new = _impute_pallas(X, fill, all_nan_receivers_idx, col)

        # receivers_idx = receivers_idx[~all_nan_dist_mask]  (stable compaction,
        # padded with -1 to keep a static shape)
        keep = jnp.logical_not(all_nan_dist_mask)
        order = jnp.argsort(jnp.logical_not(keep).astype(jnp.int32), stable=True)
        n_keep = jnp.sum(keep)
        recv_compact = jnp.where(jnp.arange(R) < n_keep,
                                 receivers_idx[order],
                                 jnp.int32(-1))

        # dist_idx_map[receivers_idx]  (glue gather; -1 rows stay -1)
        row_map = jnp.where(
            recv_compact >= 0,
            dist_idx_map[jnp.clip(recv_compact, 0, N - 1)],
            jnp.int32(-1))

        ds = _gather_pallas(dist_chunk, row_map, potential_donors_idx)
        return X_new, ds, recv_compact

    def identity_branch(_):
        return X, dist_subset, receivers_idx

    return jax.lax.cond(n_all_nan > 0, all_nan_branch, identity_branch, None)


# ----------------------------------------------------------------------------
if __name__ == "__main__":
    N, F, COL = 16, 128, 5    # X: (n_samples, n_features), lane-dense F
    M = 128                   # n fit samples
    C = 128                   # dist_chunk rows
    R, D, A = 8, 128, 4       # receivers, potential donors, padded all-nan slots

    key = jax.random.PRNGKey(0)
    ks = jax.random.split(key, 8)
    X = jax.random.normal(ks[0], (N, F), jnp.float32)
    fit_X = jax.random.normal(ks[1], (M, F), jnp.float32)
    mask_fit_X = jax.random.bernoulli(ks[2], 0.3, (M, F))
    dist_chunk = jax.random.normal(ks[3], (C, M), jnp.float32)
    dist_idx_map = jax.random.randint(ks[4], (N,), 0, C, jnp.int32)
    receivers_idx = jax.random.randint(ks[5], (R,), 0, N, jnp.int32)
    potential_donors_idx = jax.random.randint(ks[6], (D,), 0, M, jnp.int32)

    all_nan_dist_mask = jnp.array(
        [False, True, False, False, True, False, False, False])
    nan_recv = receivers_idx[jnp.array([1, 4])]
    all_nan_receivers_idx = jnp.concatenate(
        [nan_recv, jnp.full((A - 2,), -1, jnp.int32)]).astype(jnp.int32)
    dist_subset_in = jnp.zeros((R, D), jnp.float32)

    fwd = jax.jit(functools.partial(col_processor_cond, col=COL))
    X_out, ds_out, recv_out = fwd(
        X, dist_subset_in, mask_fit_X, fit_X, receivers_idx,
        all_nan_receivers_idx, all_nan_dist_mask, dist_chunk,
        dist_idx_map, potential_donors_idx)
    jax.block_until_ready((X_out, ds_out, recv_out))

    # --- reference (numpy, mirrors the PyTorch all-nan branch) ---
    Xn = np.array(X)
    mask_ = (~np.array(mask_fit_X)[:, COL]).astype(np.float32)
    mask_sum = mask_.sum()
    col_sum = float((np.array(fit_X)[:, COL] * mask_).sum())
    fill = col_sum / (mask_sum if mask_sum > 0 else 1.0)
    X_ref = Xn.copy()
    valid = np.array(all_nan_receivers_idx)
    valid = valid[valid >= 0]
    X_ref[valid, COL] = fill
    keep = ~np.array(all_nan_dist_mask)
    recv_kept = np.array(receivers_idx)[keep]
    ds_ref = np.array(dist_chunk)[np.array(dist_idx_map)[recv_kept]][
        :, np.array(potential_donors_idx)]

    nk = recv_kept.shape[0]
    np.testing.assert_allclose(np.array(X_out), X_ref, rtol=1e-5, atol=1e-5)
    np.testing.assert_array_equal(np.array(recv_out)[:nk], recv_kept)
    np.testing.assert_allclose(np.array(ds_out)[:nk], ds_ref, rtol=1e-5, atol=1e-5)

    print("KERNEL_OK")
</pallas_src>

<mosaic_0001>
module attributes {stable_mosaic.version = 11 : i64} {
  func.func @kernel(%arg0: i32, %arg1: memref<4xi32, #tpu.memory_space<smem>>, %arg2: memref<1xf32, #tpu.memory_space<smem>>, %arg3: memref<1x1x128xf32, #tpu.memory_space<vmem>>, %arg4: memref<1x1x128xf32, #tpu.memory_space<vmem>>) attributes {dimension_semantics = [#tpu.dimension_semantics<arbitrary>], iteration_bounds = array<i64: 4>, scalar_prefetch = 1 : i64, scratch_operands = 0 : i64, tpu.core_type = #tpu.core_type<tc>, window_params = [{transform_indices = @transform_0, window_bounds = array<i64: 1>}, {transform_indices = @transform_1, window_bounds = array<i64: 1, 1, 128>}, {transform_indices = @transform_2, window_bounds = array<i64: 1, 1, 128>}]} {
    %c0 = arith.constant 0 : index
    %c0_0 = arith.constant 0 : index
    %c0_1 = arith.constant 0 : index
    %0 = vector.load %arg3[%c0, %c0_0, %c0_1] : memref<1x1x128xf32, #tpu.memory_space<vmem>>, vector<1x1x128xf32>
    %1 = tpu.iota {dimensions = array<i32: 2>} : vector<1x1x128xi32>
    %c5_i32 = arith.constant 5 : i32
    %2 = vector.broadcast %c5_i32 : i32 to vector<1x1x128xi32>
    %3 = arith.cmpi eq, %1, %2 : vector<1x1x128xi32>
    %c0_2 = arith.constant 0 : index
    %4 = memref.load %arg2[%c0_2] : memref<1xf32, #tpu.memory_space<smem>>
    %5 = vector.broadcast %4 : f32 to vector<1x1x128xf32>
    %6 = arith.select %3, %5, %0 : vector<1x1x128xi1>, vector<1x1x128xf32>
    %c0_3 = arith.constant 0 : index
    %c0_4 = arith.constant 0 : index
    %c0_5 = arith.constant 0 : index
    %7 = vector.load %arg4[%c0_3, %c0_4, %c0_5] : memref<1x1x128xf32, #tpu.memory_space<vmem>>, vector<1x1x128xf32>
    tpu.vector_store %arg4[%c0_3, %c0_4, %c0_5], %6 {strides = array<i32>} : memref<1x1x128xf32, #tpu.memory_space<vmem>>, vector<1x1x128xf32>,
    return
  }
  func.func @transform_0(%arg0: i32, %arg1: memref<4xi32, #tpu.memory_space<smem>>) -> i32 {
    %c0_i32 = arith.constant 0 : i32
    %c0_i32_0 = arith.constant 0 : i32
    return %c0_i32 : i32
  }
  func.func @transform_1(%arg0: i32, %arg1: memref<4xi32, #tpu.memory_space<smem>>) -> (i32, i32, i32) {
    %0 = arith.index_cast %arg0 : i32 to index
    %1 = memref.load %arg1[%0] : memref<4xi32, #tpu.memory_space<smem>>
    %c0_i32 = arith.constant 0 : i32
    %c0_i32_0 = arith.constant 0 : i32
    %c0_i32_1 = arith.constant 0 : i32
    return %1, %c0_i32, %c0_i32_0 : i32, i32, i32
  }
  func.func @transform_2(%arg0: i32, %arg1: memref<4xi32, #tpu.memory_space<smem>>) -> (i32, i32, i32) {
    %0 = arith.index_cast %arg0 : i32 to index
    %1 = memref.load %arg1[%0] : memref<4xi32, #tpu.memory_space<smem>>
    %c0_i32 = arith.constant 0 : i32
    %c0_i32_0 = arith.constant 0 : i32
    %c0_i32_1 = arith.constant 0 : i32
    return %1, %c0_i32, %c0_i32_0 : i32, i32, i32
  }
}

module attributes {stable_mosaic.version = 11 : i64} {
  func.func @kernel(%arg0: i32, %arg1: memref<8xi32, #tpu.memory_space<smem>>, %arg2: memref<128x128xf32, #tpu.memory_space<vmem>>, %arg3: memref<1x1x128xf32, #tpu.memory_space<vmem>>, %arg4: memref<8x128xf32, #tpu.memory_space<vmem>>, %arg5: memref<8x128xf32, #tpu.memory_space<vmem>>) attributes {dimension_semantics = [#tpu.dimension_semantics<arbitrary>], iteration_bounds = array<i64: 8>, scalar_prefetch = 1 : i64, scratch_operands = 1 : i64, tpu.core_type = #tpu.core_type<tc>, window_params = [{pipeline_mode = #tpu.pipeline_mode<synchronous>, transform_indices = @transform_0, window_bounds = array<i64: 128, 128>}, {transform_indices = @transform_1, window_bounds = array<i64: 1, 1, 128>}, {pipeline_mode = #tpu.pipeline_mode<synchronous>, transform_indices = @transform_2, window_bounds = array<i64: 8, 128>}]} {
    %0 = arith.index_cast %arg0 : i32 to index
    %1 = memref.load %arg1[%0] : memref<8xi32, #tpu.memory_space<smem>>
    %c0_i32 = arith.constant 0 : i32
    %2 = arith.cmpi sge, %1, %c0_i32 : i32
    %3 = arith.extui %2 : i1 to i32
    %4 = arith.sitofp %3 : i32 to f32
    %c0 = arith.constant 0 : index
    %c0_0 = arith.constant 0 : index
    %c0_1 = arith.constant 0 : index
    %5 = vector.load %arg3[%c0, %c0_0, %c0_1] : memref<1x1x128xf32, #tpu.memory_space<vmem>>, vector<1x1x128xf32>
    %6 = vector.shape_cast %5 : vector<1x1x128xf32> to vector<1x128xf32>
    %7 = vector.broadcast %4 : f32 to vector<1x128xf32>
    %8 = arith.mulf %6, %7 : vector<1x128xf32>
    %9 = arith.index_cast %arg0 : i32 to index
    %c0_2 = arith.constant 0 : index
    %10 = vector.load %arg5[%9, %c0_2] : memref<8x128xf32, #tpu.memory_space<vmem>>, vector<1x128xf32>
    tpu.vector_store %arg5[%9, %c0_2], %8 {strides = array<i32>} : memref<8x128xf32, #tpu.memory_space<vmem>>, vector<1x128xf32>,
    %c7_i32 = arith.constant 7 : i32
    %11 = arith.cmpi eq, %arg0, %c7_i32 : i32
    %12 = arith.extui %11 : i1 to i32
    %c0_i32_3 = arith.constant 0 : i32
    %13 = arith.cmpi ne, %12, %c0_i32_3 : i32
    scf.if %13 {
      %c0_4 = arith.constant 0 : index
      %c0_5 = arith.constant 0 : index
      %14 = vector.load %arg5[%c0_4, %c0_5] : memref<8x128xf32, #tpu.memory_space<vmem>>, vector<8x128xf32>
      %c0_6 = arith.constant 0 : index
      %c0_7 = arith.constant 0 : index
      %15 = vector.load %arg2[%c0_6, %c0_7] : memref<128x128xf32, #tpu.memory_space<vmem>>, vector<128x128xf32>
      %cst = arith.constant dense<0.000000e+00> : vector<8x128xf32>
      %16 = tpu.matmul %14, %15, %cst {dimension_numbers = #tpu.dot_dimension_numbers<[1], [0], [0], [1], [0, 0, 1, 1], [], []>, precision = #tpu.contract_precision<fp32>} : vector<8x128xf32>, vector<128x128xf32>, vector<8x128xf32> -> vector<8x128xf32>
      %c0_8 = arith.constant 0 : index
      %c0_9 = arith.constant 0 : index
      %17 = vector.load %arg4[%c0_8, %c0_9] : memref<8x128xf32, #tpu.memory_space<vmem>>, vector<8x128xf32>
      tpu.vector_store %arg4[%c0_8, %c0_9], %16 {strides = array<i32>} : memref<8x128xf32, #tpu.memory_space<vmem>>, vector<8x128xf32>,
    } else {
    }
    return
  }
  func.func @transform_0(%arg0: i32, %arg1: memref<8xi32, #tpu.memory_space<smem>>) -> (i32, i32) {
    %c0_i32 = arith.constant 0 : i32
    %c0_i32_0 = arith.constant 0 : i32
    %c0_i32_1 = arith.constant 0 : i32
    return %c0_i32, %c0_i32_0 : i32, i32
  }
  func.func @transform_1(%arg0: i32, %arg1: memref<8xi32, #tpu.memory_space<smem>>) -> (i32, i32, i32) {
    %0 = arith.index_cast %arg0 : i32 to index
    %1 = memref.load %arg1[%0] : memref<8xi32, #tpu.memory_space<smem>>
    %c0_i32 = arith.constant 0 : i32
    %2 = arith.maxsi %1, %c0_i32 : i32
    %c0_i32_0 = arith.constant 0 : i32
    %c0_i32_1 = arith.constant 0 : i32
    %c0_i32_2 = arith.constant 0 : i32
    return %2, %c0_i32_0, %c0_i32_1 : i32, i32, i32
  }
  func.func @transform_2(%arg0: i32, %arg1: memref<8xi32, #tpu.memory_space<smem>>) -> (i32, i32) {
    %c0_i32 = arith.constant 0 : i32
    %c0_i32_0 = arith.constant 0 : i32
    %c0_i32_1 = arith.constant 0 : i32
    return %c0_i32, %c0_i32_0 : i32, i32
  }
}

</mosaic_0001>

<bundles_post_ra>
// kernel: branch_1_fun.2
= control target key start
LH: loop header
LB: loop body
LE: loop exit
PB: predicated region body
PF: predicated region fallthrough
CT: control target
= control target key end

     0   :  { %s280_s0 = inlined_call_operand.vmem [shape: s32[4], index: 0, kind: input, shape index: {}]   ;;  %s281_s1 = inlined_call_operand.<no memory space> [shape: f32[1], index: 1, kind: input, shape index: {}]   ;;  %s282_s2 = inlined_call_operand.vmem [shape: f32[16,1,128], index: 2, kind: input, shape index: {}, may-alias: {2,3}]   ;;  %s283_s3 = inlined_call_operand.vmem [shape: f32[16,1,128], index: 3, kind: output, shape index: {}, may-alias: {2,3}]  }
   0x1   :  { %s8_s14 = sshll.u32 %s280_s0, 4  ;;  %12 = sst [smem:[#allocation4]] %s281_s1  ;;  %s9_s14 = int_to_ptr.vmem [resolvable:$true] %s8_s14 }
   0x2   :  { %s225_s17 = scalar_lea.vmem %s9_s14, 16  ;;  %p230_p1 = scmp.lt.s32.totalorder %s9_s14, %s9_s14 }
   0x3   :  { %p226_p0 = scmp.ne.s32.totalorder %s9_s14, %s225_s17  ;;  %p231_p2 = scmp.lt.s32.totalorder %s225_s17, %s225_s17 }
   0x5   :  { %p232_p3 = por %p231_p2, %p230_p1 }
   0x7   :  { %p233_p4 = pnand %p232_p3, %p226_p0 }
   0x9   :  { %236 = shalt.err (!%p233_p4)  }
   0xa   :  { %s247_s18 = smov [#allocation3]  }
   0xb   :  { %11 = dma.vmem_to_smem %s9_s14, 16, %s247_s18, [#allocation2] }
   0xc   :  { %241 = dma.done.wait [#allocation2], 16 }
   0xd   :  { %242 = vsyncadd [#allocation2], 4294967280 }
   0xe   :  { %14 = sfence }
   0xf   :  { %s243_s19 = smov 0  }
  0x10 LB: > { %s209_s0 = sadd.s32 4294967295, %s245_s19   ;;  %p213_p5 = scmp.ge.s32.totalorder %s245_s19, 1  ;;  %s245_s19 = sphi %s243_s19, %s20_s19  }
  0x11   : > { %p124_p6 = scmp.lt.s32.totalorder %s245_s19, 5 }
  0x13   : > { %p125_p7 = pnand %p213_p5, %p124_p6 }
  0x14   : > { %s144_s1 = sld [smem:[#allocation3 + %s209_s0]] (!%p125_p7)  ;;  %v155_v0 = vlaneseq (!%p125_p7) }
  0x15   : > { %128 = sbr.rel (%p125_p7) target bundleno = 33 (0x21), region = 28  ;;  %s149_s20 = sld [smem:[#allocation3 + %s209_s0]] (!%p125_p7) }
  0x16   : > { %s158_s21 = sld [smem:[#allocation4]] (!%p125_p7)  ;;  %v156_v1 = vand.u32 (!%p125_p7), 127, %v155_v0 }
  0x18   : > { %vm157_vm0 = vcmp.eq.s32.totalorder (!%p125_p7), %v156_v1, 5 }
  0x1a   : > { %p145_p8 = scmp.lt.s32.totalorder (!%p125_p7), %s144_s1, 15 }
  0x1b   : > { %p150_p9 = scmp.lt.s32.totalorder (!%p125_p7), %s149_s20, 15 }
  0x1c   : > { %s285_s1 = smov (!%p145_p8, %s144_s1), 15  ;;  %v159_v2 = vstv %s158_s21 }
  0x1d   : > { %s287_s20 = smov (!%p150_p9, %s149_s20), 15  ;;  %s147_s24 = scalar_lea.vmem %s282_s2, %s285_s1 }
  0x1e   : > { %s152_s27 = scalar_lea.vmem %s283_s3, %s287_s20  ;;  %v154_v3 = vld [vmem:[%s147_s24] sm:$0x1] }
  0x1f   : > { %v160_v4 = vsel %vm157_vm0, %v159_v2, %v154_v3 }
  0x20   : > { %161 = vst [vmem:[%s152_s27] sm:$0x1] %v160_v4 }
  0x21 PF: > { %s20_s19 = sadd.s32 1, %s245_s19  }
  0x22   : > { %p17_p10 = scmp.ge.s32.totalorder %s20_s19, 6  }
  0x24   :  { %19 = sbr.rel (!%p17_p10) target bundleno = 16 (0x10), region = 58 }

// kernel: branch_1_fun.3
= control target key start
LH: loop header
LB: loop body
LE: loop exit
PB: predicated region body
PF: predicated region fallthrough
CT: control target
= control target key end

     0   :  { %s1790_s0 = inlined_call_operand.vmem [shape: s32[8], index: 0, kind: input, shape index: {}]   ;;  %s1791_s1 = inlined_call_operand.vmem [shape: f32[128,128], index: 1, kind: input, shape index: {}]   ;;  %s1792_s2 = inlined_call_operand.vmem [shape: f32[128,1,128], index: 2, kind: input, shape index: {}]   ;;  %s1793_s3 = inlined_call_operand.hbm [shape: f32[8,128], index: 3, kind: output, shape index: {}]  }
   0x1   :  { %s8_s14 = sshll.u32 %s1790_s0, 4  ;;  %s9_s14 = int_to_ptr.vmem [resolvable:$true] %s8_s14 }
   0x2   :  { %s1372_s15 = scalar_lea.vmem %s9_s14, 16  ;;  %p1377_p1 = scmp.lt.s32.totalorder %s9_s14, %s9_s14 }
   0x3   :  { %p1373_p0 = scmp.ne.s32.totalorder %s9_s14, %s1372_s15  ;;  %p1378_p2 = scmp.lt.s32.totalorder %s1372_s15, %s1372_s15 }
   0x5   :  { %p1379_p3 = por %p1378_p2, %p1377_p1 }
   0x7   :  { %p1380_p4 = pnand %p1379_p3, %p1373_p0 }
   0x9   :  { %1383 = shalt.err (!%p1380_p4)  }
   0xa   :  { %s1424_s16 = smov [#allocation4]  }
   0xb   :  { %11 = dma.vmem_to_smem %s9_s14, 16, %s1424_s16, [#allocation3] }
   0xc   :  { %1414 = dma.done.wait [#allocation3], 16 }
   0xd   :  { %1415 = vsyncadd [#allocation3], 4294967280 }
   0xe   :  { %13 = sfence }
   0xf   :  { %14 = vsyncpa [#allocation6], 0  ;;  %s1452_s17 = smov 0  }
  0x10 LB: > { %s1458_s0 = sadd.s32 4294967295, %s1422_s17   ;;  %p871_p5 = scmp.ge.s32.totalorder %s1422_s17, 1  ;;  %s1422_s17 = sphi %s1452_s17, %s20_s17  }
  0x11   : > { %p125_p6 = scmp.lt.s32.totalorder %s1422_s17, 9 }
  0x13   : > { %p126_p7 = pnand %p871_p5, %p125_p6 }
  0x14   : > { %s143_s18 = sld [smem:[#allocation4 + %s1458_s0]] (!%p126_p7)  ;;  %s885_s25 = scalar_lea.vmem (!%p126_p7), [#allocation2], %s1422_s17 }
  0x15   : > { %129 = sbr.rel (%p126_p7) target bundleno = 370 (0x172), region = 28  ;;  %s152_s19 = sld [smem:[#allocation4 + %s1458_s0]] (!%p126_p7) }
  0x16   : > { %p878_p11 = scmp.ne.s32.totalorder (!%p126_p7), %s1458_s0, 7 }
  0x1a   : > { %p144_p8 = scmp.gt.s32.totalorder (!%p126_p7), %s143_s18, 0  ;;  %p872_p9 = scmp.lt.s32.totalorder (!%p126_p7), %s143_s18, 127 }
  0x1b   : > { %p153_p10 = scmp.ge.s32.totalorder (!%p126_p7), %s152_s19, 0 }
  0x1c   : > { %s1795_s18 = smov (!%p144_p8, %s143_s18), 0  ;;  %v166_v3 = vld [vmem:[%s1791_s1] sm:$0xff] (!%p878_p11)  ;;  %v167_v4 = vld [vmem:[%s1791_s1 + $0x8] sm:$0xff] (!%p878_p11)  ;;  %v168_v5 = vld [vmem:[%s1791_s1 + $0x10] sm:$0xff] (!%p878_p11)  ;;  %v1425_v6 = vmov (!%p878_p11), 0.0|0.0   ;;  %vm1426_vm0 = vmmov (!%p878_p11), 0  }
  0x1d   : > { %s154_s20 = scalar_select %p153_p10, 1, 0 }
  0x1e   : > { %s1797_s18 = smov (!%p872_p9, %s1795_s18), 127  ;;  %164 = sbr.rel (%p878_p11) target bundleno = 345 (0x159), region = 32 }
  0x1f   : > { %s155_s21 = scvt.s32.f32 %s154_s20  ;;  %s148_s24 = scalar_lea.vmem %s1792_s2, %s1797_s18  ;;  %1200 = vmatprep.subr.bf16.mxu1 (!%p878_p11), %v1425_v6  ;;  %1272 = vmatprep.subr.bf16.mxu0 (!%p878_p11), %v1425_v6  ;;  %v183_v7 = vand.u32 (!%p878_p11), 4294901760, %v166_v3  ;;  %v186_v8 = vand.u32 (!%p878_p11), 4294901760, %v167_v4  ;;  %v169_v9 = vld [vmem:[%s1791_s1 + $0x18] sm:$0xff] (!%p878_p11)  ;;  %v189_v10 = vand.u32 (!%p878_p11), 4294901760, %v168_v5  ;;  %v170_v12 = vld [vmem:[%s1791_s1 + $0x20] sm:$0xff] (!%p878_p11)  ;;  %v171_v13 = vld [vmem:[%s1791_s1 + $0x28] sm:$0xff] (!%p878_p11) }
  0x20   : > { %v156_v0 = vld [vmem:[%s148_s24] sm:$0x1]  ;;  %v192_v11 = vand.u32 (!%p878_p11), 4294901760, %v169_v9  ;;  %v1427_v14 = vmov (!%p878_p11), 0.0   ;;  %v195_v17 = vand.u32 (!%p878_p11), 4294901760, %v170_v12  ;;  %v198_v18 = vand.u32 (!%p878_p11), 4294901760, %v171_v13 }
  0x21   : > { %v157_v1 = vstv %s155_s21  ;;  %1022 = vmatprep.mubr.msk.f32.mxu1 (!%p878_p11), %vm1426_vm0, %v1427_v14  ;;  %1127 = vmatprep.mubr.msk.f32.mxu0 (!%p878_p11), %vm1426_vm0, %v1427_v14  ;;  %v1493_v15 = vpack.c.bf16 (!%p878_p11), %v186_v8, %v183_v7  ;;  %v172_v19 = vld [vmem:[%s1791_s1 + $0x30] sm:$0xff] (!%p878_p11)  ;;  %v173_v20 = vld [vmem:[%s1791_s1 + $0x38] sm:$0xff] (!%p878_p11)  ;;  %v1516_v24 = vld [vmem:[%s1791_s1 + $0x40] sm:$0xff] (!%p878_p11)  ;;  %v1541_v32 = vsub.f32 (!%p878_p11), %v166_v3, %v183_v7  ;;  %v1545_v34 = vsub.f32 (!%p878_p11), %v167_v4, %v186_v8 }
  0x22   : > { %v158_v2 = vmul.f32 %v157_v1, %v156_v0  ;;  %v1497_v16 = vpack.c.bf16 (!%p878_p11), %v192_v11, %v189_v10  ;;  %v1509_v21 = vpack.c.bf16 (!%p878_p11), %v198_v18, %v195_v17  ;;  %v201_v22 = vand.u32 (!%p878_p11), 4294901760, %v172_v19  ;;  %v1521_v25 = vld [vmem:[%s1791_s1 + $0x48] sm:$0xff] (!%p878_p11)  ;;  %v1534_v30 = vld [vmem:[%s1791_s1 + $0x50] sm:$0xff] (!%p878_p11)  ;;  %v1539_v31 = vld [vmem:[%s1791_s1 + $0x58] sm:$0xff] (!%p878_p11) }
  0x23   : > { %1202 = vmatpush3.bf16.msra.mxu1 (!%p878_p11), %v1493_v15  ;;  %1274 = vmatpush3.bf16.msra.mxu0 (!%p878_p11), %v1493_v15  ;;  %v204_v23 = vand.u32 (!%p878_p11), 4294901760, %v173_v20  ;;  %v207_v27 = vand.u32 (!%p878_p11), 4294901760, %v1516_v24  ;;  %v210_v28 = vand.u32 (!%p878_p11), 4294901760, %v1521_v25  ;;  %v213_v36 = vand.u32 (!%p878_p11), 4294901760, %v1534_v30  ;;  %v1556_v38 = vld [vmem:[%s1791_s1 + $0x60] sm:$0xff] (!%p878_p11)  ;;  %v1563_v39 = vld [vmem:[%s1791_s1 + $0x68] sm:$0xff] (!%p878_p11) }
  0x24   : > { %887 = vst [vmem:[%s885_s25 - $0x1] sm:$0x1] %v158_v2  ;;  %1203 = vmatprep.subr.bf16.mxu1 (!%p878_p11), %v1425_v6  ;;  %1275 = vmatprep.subr.bf16.mxu0 (!%p878_p11), %v1425_v6  ;;  %v216_v37 = vand.u32 (!%p878_p11), 4294901760, %v1539_v31  ;;  %v1565_v40 = vsub.f32 (!%p878_p11), %v168_v5, %v189_v10  ;;  %v1567_v41 = vsub.f32 (!%p878_p11), %v169_v9, %v192_v11  ;;  %v219_v42 = vand.u32 (!%p878_p11), 4294901760, %v1556_v38  ;;  %v1585_v46 = vld [vmem:[%s1791_s1 + $0x70] sm:$0xff] (!%p878_p11)  ;;  %v1590_v47 = vld [vmem:[%s1791_s1 + $0x78] sm:$0xff] (!%p878_p11) }
  0x25   : > { %v1525_v26 = vpack.c.bf16 %v204_v23, %v201_v22  ;;  %v1549_v35 = vpack.c.bf16 %v210_v28, %v207_v27  ;;  %v222_v45 = vand.u32 4294901760, %v1563_v39  ;;  %v276_v48 = vand.u32 4294901760, %v1541_v32 }
  0x26   : > { %v1579_v44 = vpack.c.bf16 %v216_v37, %v213_v36  ;;  %v283_v49 = vand.u32 4294901760, %v1545_v34  ;;  %v1596_v50 = vsub.f32 %v170_v12, %v195_v17  ;;  %v1598_v51 = vsub.f32 %v171_v13, %v198_v18 }
  0x27   : > { %1205 = vmatpush3.bf16.msra.mxu1 %v1497_v16  ;;  %1277 = vmatpush3.bf16.msra.mxu0 %v1497_v16  ;;  %v225_v52 = vand.u32 4294901760, %v1585_v46  ;;  %v228_v53 = vand.u32 4294901760, %v1590_v47  ;;  %v290_v55 = vand.u32 4294901760, %v1565_v40  ;;  %v1610_v56 = vpack.c.bf16 %v222_v45, %v219_v42 }
  0x28   : > { %1206 = vmatprep.subr.bf16.mxu1 %v1425_v6  ;;  %1278 = vmatprep.subr.bf16.mxu0 %v1425_v6  ;;  %v277_v57 = vsub.f32 %v1541_v32, %v276_v48  ;;  %v284_v58 = vsub.f32 %v1545_v34, %v283_v49  ;;  %v297_v59 = vand.u32 4294901760, %v1567_v41  ;;  %v1617_v60 = vsub.f32 %v172_v19, %v201_v22 }
  0x29   : > { %v1619_v61 = vsub.f32 %v173_v20, %v204_v23  ;;  %v291_v63 = vsub.f32 %v1565_v40, %v290_v55  ;;  %v304_v0 = vand.u32 4294901760, %v1596_v50  ;;  %v311_v1 = vand.u32 4294901760, %v1598_v51 }
  0x2a   : > { %v1631_v2 = vpack.c.bf16 %v228_v53, %v225_v52  ;;  %v278_v3 = vand.u32 4294901760, %v277_v57  ;;  %v285_v4 = vand.u32 4294901760, %v284_v58  ;;  %v298_v5 = vsub.f32 %v1567_v41, %v297_v59 }
  0x2b   : > { %1208 = vmatpush3.bf16.msra.mxu1 %v1509_v21  ;;  %1280 = vmatpush3.bf16.msra.mxu0 %v1509_v21  ;;  %v165_v29 = vld [vmem:[#allocation2] sm:$0xff]  ;;  %v1637_v7 = vsub.f32 %v1516_v24, %v207_v27  ;;  %v1640_v8 = vsub.f32 %v1521_v25, %v210_v28  ;;  %v1297_v9 = vpack.c.bf16 %v283_v49, %v276_v48  ;;  %v292_v11 = vand.u32 4294901760, %v291_v63 }
  0x2c   : > { %1209 = vmatprep.subr.bf16.mxu1 %v1425_v6  ;;  %1281 = vmatprep.subr.bf16.mxu0 %v1425_v6  ;;  %v1543_v33 = vand.u32 4294901760, %v165_v29  ;;  %v305_v12 = vsub.f32 %v1596_v50, %v304_v0  ;;  %v312_v13 = vsub.f32 %v1598_v51, %v311_v1  ;;  %v1225_v17 = vpack.c.bf16 %v285_v4, %v278_v3 }
  0x2d   : > { %v299_v18 = vand.u32 4294901760, %v298_v5  ;;  %v318_v19 = vand.u32 4294901760, %v1617_v60  ;;  %v325_v20 = vand.u32 4294901760, %v1619_v61  ;;  %v1653_v22 = vsub.f32 %v1534_v30, %v213_v36 }
  0x2e   : > { %v1571_v43 = vsub.f32 %v165_v29, %v1543_v33  ;;  %v1658_v23 = vsub.f32 %v1539_v31, %v216_v37  ;;  %v1300_v24 = vpack.c.bf16 %v297_v59, %v290_v55  ;;  %v306_v25 = vand.u32 4294901760, %v305_v12 }
  0x2f   : > { %1211 = vmatpush3.bf16.msra.mxu1 %v1525_v26  ;;  %1283 = vmatpush3.bf16.msra.mxu0 %v1525_v26  ;;  %v313_v27 = vand.u32 4294901760, %v312_v13  ;;  %v332_v28 = vand.u32 4294901760, %v1637_v7  ;;  %v1228_v29 = vpack.c.bf16 %v299_v18, %v292_v11  ;;  %v319_v48 = vsub.f32 %v1617_v60, %v318_v19 }
  0x30   : > { %1212 = vmatprep.subr.bf16.mxu1 %v1425_v6  ;;  %1284 = vmatprep.subr.bf16.mxu0 %v1425_v6  ;;  %v265_v54 = vand.u32 4294901760, %v1571_v43  ;;  %v326_v30 = vsub.f32 %v1619_v61, %v325_v20  ;;  %v339_v36 = vand.u32 4294901760, %v1640_v8  ;;  %v1669_v31 = vsub.f32 %v1556_v38, %v219_v42 }
  0x31   : > { %v1674_v37 = vsub.f32 %v1563_v39, %v222_v45  ;;  %v1231_v49 = vpack.c.bf16 %v313_v27, %v306_v25  ;;  %v333_v55 = vsub.f32 %v1637_v7, %v332_v28  ;;  %v346_v57 = vand.u32 4294901760, %v1653_v22 }
  0x32   : > { %v266_v62 = vsub.f32 %v1571_v43, %v265_v54  ;;  %v320_v38 = vand.u32 4294901760, %v319_v48  ;;  %v327_v42 = vand.u32 4294901760, %v326_v30  ;;  %v340_v58 = vsub.f32 %v1640_v8, %v339_v36 }
  0x33   : > { %1214 = vmatpush3.bf16.msra.mxu1 %v1549_v35  ;;  %1286 = vmatpush3.bf16.msra.mxu0 %v1549_v35  ;;  %v353_v39 = vand.u32 4294901760, %v1658_v23  ;;  %v1689_v45 = vsub.f32 %v1585_v46, %v225_v52  ;;  %v1694_v59 = vsub.f32 %v1590_v47, %v228_v53  ;;  %v334_v63 = vand.u32 4294901760, %v333_v55 }
  0x34   : > { %1215 = vmatprep.subr.bf16.mxu1 %v1425_v6  ;;  %1287 = vmatprep.subr.bf16.mxu0 %v1425_v6  ;;  %v267_v10 = vand.u32 4294901760, %v266_v62  ;;  %v1306_v62 = vpack.c.bf16 %v325_v20, %v318_v19  ;;  %v1234_v3 = vpack.c.bf16 %v327_v42, %v320_v38  ;;  %v341_v4 = vand.u32 4294901760, %v340_v58 }
  0x35   : > { %v354_v5 = vsub.f32 %v1658_v23, %v353_v39  ;;  %v367_v46 = vand.u32 4294901760, %v1674_v37  ;;  %v1309_v47 = vpack.c.bf16 %v339_v36, %v332_v28  ;;  %v381_v13 = vand.u32 4294901760, %v1694_v59 }
  0x37   : > { %1217 = vmatpush3.bf16.msra.mxu1 %v1579_v44  ;;  %1289 = vmatpush3.bf16.msra.mxu0 %v1579_v44  ;;  %v355_v11 = vand.u32 4294901760, %v354_v5  ;;  %v368_v12 = vsub.f32 %v1674_v37, %v367_v46  ;;  %v382_v25 = vsub.f32 %v1694_v59, %v381_v13 }
  0x38   : > { %1218 = vmatprep.subr.bf16.mxu1 %v1425_v6  ;;  %1290 = vmatprep.subr.bf16.mxu0 %v1425_v6 }
  0x39   : > { %v369_v20 = vand.u32 4294901760, %v368_v12  ;;  %v383_v48 = vand.u32 4294901760, %v382_v25 }
  0x3b   : > { %1220 = vmatpush3.bf16.msra.mxu1 %v1610_v56  ;;  %1292 = vmatpush3.bf16.msra.mxu0 %v1610_v56 }
  0x3c   : > { %1221 = vmatprep.subr.bf16.mxu1 %v1425_v6  ;;  %1293 = vmatprep.subr.bf16.mxu0 %v1425_v6 }
  0x3f   : > { %1223 = vmatpush3.bf16.msra.mxu1 %v1631_v2  ;;  %1295 = vmatpush3.bf16.msra.mxu0 %v1631_v2 }
  0x40   : > { %1224 = vmatprep.subr.bf16.mxu1 %v1425_v6  ;;  %1296 = vmatprep.subr.bf16.mxu0 %v1425_v6 }
  0x42   : > { %1023 = vmatmul.mubr.f32.vlgmr.msra.gmra.mrb[0].mxu1 %v267_v10  ;;  %1128 = vmatmul.mubr.f32.vlgmr.msra.gmra.mrb[0].mxu0 %v265_v54  ;;  %v1303_v54 = vpack.c.bf16 %v311_v1, %v304_v0  ;;  %v347_v0 = vsub.f32 %v1653_v22, %v346_v57  ;;  %v360_v1 = vand.u32 4294901760, %v1669_v31  ;;  %v1237_v10 = vpack.c.bf16 %v341_v4, %v334_v63 }
  0x43   : > { %1226 = vmatpush3.bf16.msra.mxu1 %v1225_v17  ;;  %1298 = vmatpush3.bf16.msra.mxu0 %v1297_v9  ;;  %v374_v9 = vand.u32 4294901760, %v1689_v45  ;;  %v1312_v17 = vpack.c.bf16 %v353_v39, %v346_v57 }
  0x44   : > { %1227 = vmatprep.subr.bf16.mxu1 %v1425_v6  ;;  %1299 = vmatprep.subr.bf16.mxu0 %v1425_v6  ;;  %v348_v52 = vand.u32 4294901760, %v347_v0  ;;  %v361_v53 = vsub.f32 %v1669_v31, %v360_v1  ;;  %v1315_v28 = vpack.c.bf16 %v367_v46, %v360_v1 }
  0x45   : > { %1057 = vmatprep.mubr.msk.f32.mxu1 %vm1426_vm0, %v1427_v14  ;;  %1162 = vmatprep.mubr.msk.f32.mxu0 %vm1426_vm0, %v1427_v14  ;;  %v1318_v36 = vpack.c.bf16 %v381_v13, %v374_v9 }
  0x46   : > { %v362_v18 = vand.u32 4294901760, %v361_v53  ;;  %v1240_v19 = vpack.c.bf16 %v355_v11, %v348_v52 }
  0x47   : > { %1229 = vmatpush3.bf16.msra.mxu1 %v1228_v29  ;;  %1301 = vmatpush3.bf16.msra.mxu0 %v1300_v24  ;;  %v375_v24 = vsub.f32 %v1689_v45, %v374_v9 }
  0x48   : > { %1230 = vmatprep.subr.bf16.mxu1 %v1425_v6  ;;  %1302 = vmatprep.subr.bf16.mxu0 %v1425_v6  ;;  %v1243_v27 = vpack.c.bf16 %v369_v20, %v362_v18 }
  0x49   : > { %v376_v29 = vand.u32 4294901760, %v375_v24 }
  0x4b   : > { %1232 = vmatpush3.bf16.msra.mxu1 %v1231_v49  ;;  %1304 = vmatpush3.bf16.msra.mxu0 %v1303_v54  ;;  %v1246_v30 = vpack.c.bf16 %v383_v48, %v376_v29  ;;  %v1249_v49 = vpack.c.bf16 %v1545_v34, %v1541_v32  ;;  %v1252_v54 = vpack.c.bf16 %v1567_v41, %v1565_v40 }
  0x4c   : > { %1233 = vmatprep.subr.bf16.mxu1 %v1425_v6  ;;  %1305 = vmatprep.subr.bf16.mxu0 %v1425_v6  ;;  %v1255_v32 = vpack.c.bf16 %v1598_v51, %v1596_v50 }
  0x4f   : > { %1235 = vmatpush3.bf16.msra.mxu1 %v1234_v3  ;;  %1307 = vmatpush3.bf16.msra.mxu0 %v1306_v62 }
  0x50   : > { %1236 = vmatprep.subr.bf16.mxu1 %v1425_v6  ;;  %1308 = vmatprep.subr.bf16.mxu0 %v1425_v6 }
  0x53   : > { %1238 = vmatpush3.bf16.msra.mxu1 %v1237_v10  ;;  %1310 = vmatpush3.bf16.msra.mxu0 %v1309_v47 }
  0x54   : > { %1239 = vmatprep.subr.bf16.mxu1 %v1425_v6  ;;  %1311 = vmatprep.subr.bf16.mxu0 %v1425_v6 }
  0x57   : > { %1241 = vmatpush3.bf16.msra.mxu1 %v1240_v19  ;;  %1313 = vmatpush3.bf16.msra.mxu0 %v1312_v17 }
  0x58   : > { %1242 = vmatprep.subr.bf16.mxu1 %v1425_v6  ;;  %1314 = vmatprep.subr.bf16.mxu0 %v1425_v6 }
  0x5b   : > { %1244 = vmatpush3.bf16.msra.mxu1 %v1243_v27  ;;  %1316 = vmatpush3.bf16.msra.mxu0 %v1315_v28 }
  0x5c   : > { %1245 = vmatprep.subr.bf16.mxu1 %v1425_v6  ;;  %1317 = vmatprep.subr.bf16.mxu0 %v1425_v6 }
  0x5f   : > { %1247 = vmatpush3.bf16.msra.mxu1 %v1246_v30  ;;  %1319 = vmatpush3.bf16.msra.mxu0 %v1318_v36 }
  0x60   : > { %1248 = vmatprep.subr.bf16.mxu1 %v1425_v6  ;;  %1320 = vmatprep.subr.bf16.mxu0 %v1425_v6 }
  0x62   : > { %1058 = vmatmul.mubr.f32.vlgmr.msra.gmra.mrb[0].mxu1 %v1543_v33  ;;  %1163 = vmatmul.mubr.f32.vlgmr.msra.gmra.mrb[0].mxu0 %v1543_v33 }
  0x63   : > { %1250 = vmatpush3.bf16.msra.mxu1 %v1249_v49  ;;  %1322 = vmatpush3.bf16.msra.mxu0 %v1493_v15  ;;  %v1258_v15 = vpack.c.bf16 %v1619_v61, %v1617_v60 }
  0x64   : > { %1251 = vmatprep.subr.bf16.mxu1 %v1425_v6  ;;  %1323 = vmatprep.subr.bf16.mxu0 %v1425_v6 }
  0x65   : > { %1092 = vmatprep.mubr.msk.f32.mxu1 %vm1426_vm0, %v1427_v14  ;;  %1197 = vmatprep.mubr.msk.f32.mxu0 %vm1426_vm0, %v1427_v14  ;;  %v1261_v14 = vpack.c.bf16 %v1640_v8, %v1637_v7 }
  0x67   : > { %1253 = vmatpush3.bf16.msra.mxu1 %v1252_v54  ;;  %1325 = vmatpush3.bf16.msra.mxu0 %v1497_v16  ;;  %v1264_v16 = vpack.c.bf16 %v1658_v23, %v1653_v22 }
  0x68   : > { %1254 = vmatprep.subr.bf16.mxu1 %v1425_v6  ;;  %1326 = vmatprep.subr.bf16.mxu0 %v1425_v6 }
  0x6b   : > { %1256 = vmatpush3.bf16.msra.mxu1 %v1255_v32  ;;  %1328 = vmatpush3.bf16.msra.mxu0 %v1509_v21  ;;  %v1267_v21 = vpack.c.bf16 %v1674_v37, %v1669_v31 }
  0x6c   : > { %1257 = vmatprep.subr.bf16.mxu1 %v1425_v6  ;;  %1329 = vmatprep.subr.bf16.mxu0 %v1425_v6 }
  0x6f   : > { %1259 = vmatpush3.bf16.msra.mxu1 %v1258_v15  ;;  %1331 = vmatpush3.bf16.msra.mxu0 %v1525_v26  ;;  %v1270_v26 = vpack.c.bf16 %v1694_v59, %v1689_v45 }
  0x70   : > { %1260 = vmatprep.subr.bf16.mxu1 %v1425_v6  ;;  %1332 = vmatprep.subr.bf16.mxu0 %v1425_v6 }
  0x73   : > { %1262 = vmatpush3.bf16.msra.mxu1 %v1261_v14  ;;  %1334 = vmatpush3.bf16.msra.mxu0 %v1549_v35 }
  0x74   : > { %1263 = vmatprep.subr.bf16.mxu1 %v1425_v6  ;;  %1335 = vmatprep.subr.bf16.mxu0 %v1425_v6 }
  0x77   : > { %1265 = vmatpush3.bf16.msra.mxu1 %v1264_v16  ;;  %1337 = vmatpush3.bf16.msra.mxu0 %v1579_v44 }
  0x78   : > { %1266 = vmatprep.subr.bf16.mxu1 %v1425_v6  ;;  %1338 = vmatprep.subr.bf16.mxu0 %v1425_v6 }
  0x7b   : > { %1268 = vmatpush3.bf16.msra.mxu1 %v1267_v21  ;;  %1340 = vmatpush3.bf16.msra.mxu0 %v1610_v56 }
  0x7c   : > { %1269 = vmatprep.subr.bf16.mxu1 %v1425_v6  ;;  %1341 = vmatprep.subr.bf16.mxu0 %v1425_v6 }
  0x7f   : > { %1271 = vmatpush3.bf16.msra.mxu1 %v1270_v26  ;;  %1343 = vmatpush3.bf16.msra.mxu0 %v1631_v2 }
  0x82   : > { %1093 = vmatmul.mubr.f32.vlgmr.msra.gmra.mrb[0].mxu1 %v1571_v43  ;;  %1198 = vmatmul.mubr.f32.vlgmr.msra.gmra.mrb[0].mxu0 %v1543_v33 }
 0x155   : > { %v524_v34 = vpop.f32.mrb[0].mxu1  ;;  %v819_v35 = vpop.f32.mrb[0].mxu0 }
 0x156   : > { %v1344_v40 = vadd.f32 %v819_v35, %v524_v34  ;;  %v1094_v41 = vpop.f32.mrb[1].mxu1  ;;  %v1199_v44 = vpop.f32.mrb[1].mxu0 }
 0x158   : > { %823 = vst [vmem:[#allocation5] sm:$0xff] %v1344_v40 }
 0x159 PF: > { %p1357_p12 = scmp.eq.s32.totalorder %s1458_s0, 7  ;;  %s1428_s5 = smov [#allocation5]  }
 0x15a   : > { %s831_s6 = sshll.u32 %s1428_s5, 4  ;;  %s832_s6 = int_to_ptr.vmem [resolvable:$true] %s831_s6 }
 0x15b   : > { %s1384_s7 = scalar_lea.vmem %s832_s6, 128  ;;  %p1391_p2 = scmp.lt.s32.totalorder %s832_s6, %s832_s6 }
 0x15c   : > { %p1385_p13 = scmp.ne.s32.totalorder %s832_s6, %s1384_s7  ;;  %p1392_p3 = scmp.lt.s32.totalorder %s1384_s7, %s1384_s7 }
 0x15e   : > { %p1386_p0 = pnand %p1385_p13, %p1357_p12  ;;  %p1393_p4 = por %p1392_p3, %p1391_p2 }
 0x160   : > { %p1387_p1 = pneg %p1386_p0 }
 0x162   : > { %p1394_p5 = pnand %p1393_p4, %p1387_p1 }
 0x164   : > { %1397 = shalt.err (!%p1394_p5)
}
 0x165   : > { %s1398_s10 = scalar_lea.hbm %s1793_s3, 128 }
 0x166   : > { %p1399_p6 = scmp.ne.s32.totalorder %s1793_s3, %s1398_s10  ;;  %p1404_p9 = scmp.lt.u32.totalorder %s1398_s10, %s1793_s3 }
 0x168   : > { %p1400_p7 = pnand %p1399_p6, %p1357_p12 }
 0x16a   : > { %p1401_p8 = pneg %p1400_p7 }
 0x16c   : > { %p1406_p10 = pnand %p1404_p9, %p1401_p8 }
 0x16e   : > { %1409 = shalt.err (!%p1406_p10)
}
 0x16f   : > { %1354 = dma.vmem_to_hbm [thread:$0]  (%p1357_p12), %s832_s6, 128, %s1793_s3, [#allocation6]  }
 0x170   : > { %1417 = dma.done.wait (%p1357_p12), [#allocation6], 128  }
 0x171   : > { %1419 = vsyncadd (%p1357_p12), [#allocation6], 4294967168 }
 0x172 PF: > { %s20_s17 = sadd.s32 1, %s1422_s17  }
 0x173   : > { %p17_p11 = scmp.ge.s32.totalorder %s20_s17, 10  }
 0x175   :  { %19 = sbr.rel (!%p17_p11) target bundleno = 16 (0x10), region = 60 }
 0x17c   :  { %844 = vsyncpa [#allocation6], 1 }
 0x17d   :  { %846 = vsyncpa [#allocation6 + $0x1], 1 }

</bundles_post_ra>
